<compile_context>
chip_gen: v6e
topology: v6e:2x2x1
jax: 0.10.0
libtpu: 0.0.40
codegen_flags: <defaults>
</compile_context>

<pallas_src>
import functools

import jax
import jax.numpy as jnp
import numpy as np
from jax.experimental import pallas as pl
from jax.experimental.pallas import tpu as pltpu

# ----------------------------- problem sizes ------------------------------
B = 256          # batch (multiple of BLOCK_B; fills f32 sublanes)
D_IN = 64        # classifier input features
H = 128          # hidden width (lane-aligned)
D_OUT = 8        # output classes
BLOCK_B = 128    # batch rows per grid step


def _sigmoid(x):
    return 1.0 / (1.0 + jnp.exp(-x))


# ------------------------------ Pallas kernel ------------------------------
def _mlp_kernel(x_ref, w1_ref, b1_ref, w2_ref, b2_ref, out_ref, *, bin_label):
    # Linear(D_in, H) + ReLU
    h = jnp.dot(x_ref[...], w1_ref[...], preferred_element_type=jnp.float32)
    h = jnp.maximum(h + b1_ref[...], 0.0)
    # Linear(H, D_out)
    logits = (jnp.dot(h, w2_ref[...], preferred_element_type=jnp.float32)
              + b2_ref[...])
    out = _sigmoid(logits) if bin_label else logits
    out_ref[...] = out.astype(out_ref.dtype)


# ------------------------------ JAX wrapper --------------------------------
def my_mlp(x, params, *, bin_label, block_b=BLOCK_B):
    """x: (B, D_in) f32; params: (w1 (D_in,H), b1 (1,H), w2 (H,D_out), b2 (1,D_out))."""
    w1, b1, w2, b2 = params
    batch, d_in = x.shape
    hid = w1.shape[1]
    d_out = w2.shape[1]
    assert batch % block_b == 0, "batch must be a multiple of the block size"

    kernel = functools.partial(_mlp_kernel, bin_label=bin_label)
    return pl.pallas_call(
        kernel,
        out_shape=jax.ShapeDtypeStruct((batch, d_out), jnp.float32),
        grid_spec=pltpu.PrefetchScalarGridSpec(
            num_scalar_prefetch=0,
            grid=(batch // block_b,),
            in_specs=[
                pl.BlockSpec((block_b, d_in), lambda i: (i, 0)),   # x tile
                pl.BlockSpec((d_in, hid),     lambda i: (0, 0)),   # W1 resident
                pl.BlockSpec((1, hid),        lambda i: (0, 0)),   # b1 resident
                pl.BlockSpec((hid, d_out),    lambda i: (0, 0)),   # W2 resident
                pl.BlockSpec((1, d_out),      lambda i: (0, 0)),   # b2 resident
            ],
            out_specs=pl.BlockSpec((block_b, d_out), lambda i: (i, 0)),
        ),
        compiler_params=pltpu.CompilerParams(
            dimension_semantics=("parallel",)),   # shard batch blocks on v7x's 2 TCs
    )(x.astype(jnp.float32), w1, b1, w2, b2)


# --------------------------- pure-JAX reference ----------------------------
def reference_forward(x, params, *, bin_label):
    w1, b1, w2, b2 = params
    h = jnp.maximum(jnp.dot(x, w1) + b1, 0.0)
    logits = jnp.dot(h, w2) + b2
    return _sigmoid(logits) if bin_label else logits


# ------------------------- deterministic parameters ------------------------
def init_params(key):
    k1, k2, k3, k4 = jax.random.split(key, 4)
    # torch.nn.Linear-style uniform(-1/sqrt(fan_in), 1/sqrt(fan_in)) init.
    lim1 = 1.0 / np.sqrt(D_IN)
    lim2 = 1.0 / np.sqrt(H)
    w1 = jax.random.uniform(k1, (D_IN, H), jnp.float32, -lim1, lim1)
    b1 = jax.random.uniform(k2, (1, H), jnp.float32, -lim1, lim1)
    w2 = jax.random.uniform(k3, (H, D_OUT), jnp.float32, -lim2, lim2)
    b2 = jax.random.uniform(k4, (1, D_OUT), jnp.float32, -lim2, lim2)
    return (w1, b1, w2, b2)


# ---------------------------------- main -----------------------------------
if __name__ == "__main__":
    key = jax.random.PRNGKey(0)
    k_params, k_x = jax.random.split(key)
    params = init_params(k_params)
    x = jax.random.normal(k_x, (B, D_IN), dtype=jnp.float32)

    # Exercise both heads of the spec: bin_label=False -> raw logits,
    # bin_label=True -> Sigmoid.
    for bin_label in (False, True):
        out = jax.block_until_ready(my_mlp(x, params, bin_label=bin_label))
        ref = jax.block_until_ready(
            reference_forward(x, params, bin_label=bin_label))
        np.testing.assert_allclose(np.asarray(out), np.asarray(ref),
                                   rtol=1e-3, atol=1e-3)
        assert out.shape == (B, D_OUT)

    print("KERNEL_OK")
</pallas_src>

<mosaic_0001>
module attributes {stable_mosaic.version = 11 : i64} {
  func.func @_mlp_kernel(%arg0: i32, %arg1: memref<128x64xf32, #tpu.memory_space<vmem>>, %arg2: memref<64x128xf32, #tpu.memory_space<vmem>>, %arg3: memref<1x128xf32, #tpu.memory_space<vmem>>, %arg4: memref<128x8xf32, #tpu.memory_space<vmem>>, %arg5: memref<1x8xf32, #tpu.memory_space<vmem>>, %arg6: memref<128x8xf32, #tpu.memory_space<vmem>>) attributes {dimension_semantics = [#tpu.dimension_semantics<parallel>], iteration_bounds = array<i64: 2>, scalar_prefetch = 0 : i64, scratch_operands = 0 : i64, tpu.core_type = #tpu.core_type<tc>, window_params = [{transform_indices = @transform_0, window_bounds = array<i64: 128, 64>}, {pipeline_mode = #tpu.pipeline_mode<synchronous>, transform_indices = @transform_1, window_bounds = array<i64: 64, 128>}, {pipeline_mode = #tpu.pipeline_mode<synchronous>, transform_indices = @transform_2, window_bounds = array<i64: 1, 128>}, {pipeline_mode = #tpu.pipeline_mode<synchronous>, transform_indices = @transform_3, window_bounds = array<i64: 128, 8>}, {pipeline_mode = #tpu.pipeline_mode<synchronous>, transform_indices = @transform_4, window_bounds = array<i64: 1, 8>}, {transform_indices = @transform_5, window_bounds = array<i64: 128, 8>}]} {
    %c0 = arith.constant 0 : index
    %c0_0 = arith.constant 0 : index
    %0 = vector.load %arg1[%c0, %c0_0] : memref<128x64xf32, #tpu.memory_space<vmem>>, vector<128x64xf32>
    %c0_1 = arith.constant 0 : index
    %c0_2 = arith.constant 0 : index
    %1 = vector.load %arg2[%c0_1, %c0_2] : memref<64x128xf32, #tpu.memory_space<vmem>>, vector<64x128xf32>
    %cst = arith.constant dense<0.000000e+00> : vector<128x128xf32>
    %2 = tpu.matmul %0, %1, %cst {dimension_numbers = #tpu.dot_dimension_numbers<[1], [0], [0], [1], [0, 0, 1, 1], [], []>} : vector<128x64xf32>, vector<64x128xf32>, vector<128x128xf32> -> vector<128x128xf32>
    %c0_3 = arith.constant 0 : index
    %c0_4 = arith.constant 0 : index
    %3 = vector.load %arg3[%c0_3, %c0_4] : memref<1x128xf32, #tpu.memory_space<vmem>>, vector<1x128xf32>
    %4 = vector.broadcast %3 : vector<1x128xf32> to vector<128x128xf32>
    %5 = arith.addf %2, %4 : vector<128x128xf32>
    %cst_5 = arith.constant 0.000000e+00 : f32
    %6 = vector.broadcast %cst_5 : f32 to vector<128x128xf32>
    %7 = arith.maximumf %5, %6 : vector<128x128xf32>
    %c0_6 = arith.constant 0 : index
    %c0_7 = arith.constant 0 : index
    %8 = vector.load %arg4[%c0_6, %c0_7] : memref<128x8xf32, #tpu.memory_space<vmem>>, vector<128x8xf32>
    %cst_8 = arith.constant dense<0.000000e+00> : vector<128x8xf32>
    %9 = tpu.matmul %7, %8, %cst_8 {dimension_numbers = #tpu.dot_dimension_numbers<[1], [0], [0], [1], [0, 0, 1, 1], [], []>} : vector<128x128xf32>, vector<128x8xf32>, vector<128x8xf32> -> vector<128x8xf32>
    %c0_9 = arith.constant 0 : index
    %c0_10 = arith.constant 0 : index
    %10 = vector.load %arg5[%c0_9, %c0_10] : memref<1x8xf32, #tpu.memory_space<vmem>>, vector<1x8xf32>
    %11 = vector.broadcast %10 : vector<1x8xf32> to vector<128x8xf32>
    %12 = arith.addf %9, %11 : vector<128x8xf32>
    %c0_11 = arith.constant 0 : index
    %c0_12 = arith.constant 0 : index
    %13 = vector.load %arg6[%c0_11, %c0_12] : memref<128x8xf32, #tpu.memory_space<vmem>>, vector<128x8xf32>
    tpu.vector_store %arg6[%c0_11, %c0_12], %12 {strides = array<i32>} : memref<128x8xf32, #tpu.memory_space<vmem>>, vector<128x8xf32>,
    return
  }
  func.func @transform_0(%arg0: i32) -> (i32, i32) {
    %c0_i32 = arith.constant 0 : i32
    %c0_i32_0 = arith.constant 0 : i32
    return %arg0, %c0_i32 : i32, i32
  }
  func.func @transform_1(%arg0: i32) -> (i32, i32) {
    %c0_i32 = arith.constant 0 : i32
    %c0_i32_0 = arith.constant 0 : i32
    %c0_i32_1 = arith.constant 0 : i32
    return %c0_i32, %c0_i32_0 : i32, i32
  }
  func.func @transform_2(%arg0: i32) -> (i32, i32) {
    %c0_i32 = arith.constant 0 : i32
    %c0_i32_0 = arith.constant 0 : i32
    %c0_i32_1 = arith.constant 0 : i32
    return %c0_i32, %c0_i32_0 : i32, i32
  }
  func.func @transform_3(%arg0: i32) -> (i32, i32) {
    %c0_i32 = arith.constant 0 : i32
    %c0_i32_0 = arith.constant 0 : i32
    %c0_i32_1 = arith.constant 0 : i32
    return %c0_i32, %c0_i32_0 : i32, i32
  }
  func.func @transform_4(%arg0: i32) -> (i32, i32) {
    %c0_i32 = arith.constant 0 : i32
    %c0_i32_0 = arith.constant 0 : i32
    %c0_i32_1 = arith.constant 0 : i32
    return %c0_i32, %c0_i32_0 : i32, i32
  }
  func.func @transform_5(%arg0: i32) -> (i32, i32) {
    %c0_i32 = arith.constant 0 : i32
    %c0_i32_0 = arith.constant 0 : i32
    return %arg0, %c0_i32 : i32, i32
  }
}

</mosaic_0001>

<bundles_post_ra>
// kernel: tpu_custom_call.1
= control target key start
LH: loop header
LB: loop body
LE: loop exit
PB: predicated region body
PF: predicated region fallthrough
CT: control target
= control target key end

     0   :  { %s969_s18 = smov 0   ;;  %s1139_s0 = inlined_call_operand.vmem [shape: f32[256,64], index: 0, kind: input, shape index: {}]   ;;  %s1140_s1 = inlined_call_operand.vmem [shape: f32[64,128], index: 1, kind: input, shape index: {}]   ;;  %s1141_s2 = inlined_call_operand.vmem [shape: f32[1,128], index: 2, kind: input, shape index: {}]   ;;  %s1142_s3 = inlined_call_operand.vmem [shape: f32[128,8], index: 3, kind: input, shape index: {}]   ;;  %s1143_s4 = inlined_call_operand.vmem [shape: f32[1,8], index: 4, kind: input, shape index: {}]   ;;  %s1144_s5 = inlined_call_operand.vmem [shape: f32[256,8], index: 5, kind: output, shape index: {}]  }
   0x1 LB: > { %s710_s19 = sadd.s32 4294967295, %s937_s18   ;;  %p714_p0 = scmp.ge.s32.totalorder %s937_s18, 1  ;;  %s937_s18 = sphi %s969_s18, %s15_s18  }
   0x2   : > { %p188_p1 = scmp.lt.s32.totalorder %s937_s18, 3 }
   0x4   : > { %p189_p2 = pnand %p714_p0, %p188_p1 }
   0x5   : > { %s715_s24 = sshll.u32 (!%p189_p2), %s710_s19, 4 }
   0x6   : > { %192 = sbr.rel (%p189_p2) target bundleno = 454 (0x1c6), region = 40  ;;  %p217_p3 = scmp.lt.s32.totalorder (!%p189_p2), %s715_s24, 31 }
   0xb   : > { %v251_v0 = vld [vmem:[%s1140_s1 + $0x38] sm:$0xff]  ;;  %v250_v1 = vld [vmem:[%s1140_s1 + $0x30] sm:$0xff]  ;;  %v249_v2 = vld [vmem:[%s1140_s1 + $0x28] sm:$0xff]  ;;  %s1146_s24 = smov (!%p217_p3, %s715_s24), 31  ;;  %vm259_vm0 = vcmask 523264   ;;  %vm637_vm1 = vcmask 64512  }
   0xc   : > { %795 = vmatprep.subr.mxu0 %v251_v0  ;;  %v484_v3 = vld [vmem:[%s1142_s3 + $0x78] sm:$0xff]  ;;  %v248_v4 = vld [vmem:[%s1140_s1 + $0x20] sm:$0xff]  ;;  %v483_v5 = vld [vmem:[%s1142_s3 + $0x70] sm:$0xff]  ;;  %s716_s8 = sshll.u32 %s1146_s24, 3 }
   0xd   : > { %796 = vmatpush3.msra.mxu0 %v251_v0  ;;  %891 = vmatprep.subr.mxu1 %v484_v3  ;;  %v247_v6 = vld [vmem:[%s1140_s1 + $0x18] sm:$0xff]  ;;  %s1006_s13 = scalar_lea.vmem %s1139_s0, %s716_s8  ;;  %v482_v7 = vld [vmem:[%s1142_s3 + $0x68] sm:$0xff]  ;;  %v246_v9 = vld [vmem:[%s1140_s1 + $0x10] sm:$0xff]  ;;  %s1102_s10 = scalar_lea.vmem %s1144_s5, %s716_s8 }
   0xe   : > { %797 = vmatprep.subr.mxu0 %v250_v1  ;;  %907 = vmatpush3.msra.mxu1 %v484_v3  ;;  %v228_v8 = vld [vmem:[%s1006_s13] sm:$0xff]  ;;  %v245_v11 = vld [vmem:[%s1140_s1 + $0x8] sm:$0xff]  ;;  %v480_v12 = vld [vmem:[%s1142_s3 + $0x58] sm:$0xff] }
   0xf   : > { %798 = vmatpush3.msra.mxu0 %v250_v1  ;;  %892 = vmatprep.subr.mxu1 %v483_v5  ;;  %v481_v10 = vld [vmem:[%s1142_s3 + $0x60] sm:$0xff]  ;;  %v479_v14 = vld [vmem:[%s1142_s3 + $0x50] sm:$0xff]  ;;  %v229_v15 = vld [vmem:[%s1006_s13 + $0x8] sm:$0xff] }
  0x10   : > { %799 = vmatprep.subr.mxu0 %v249_v2  ;;  %908 = vmatpush3.msra.mxu1 %v483_v5  ;;  %v244_v13 = vld [vmem:[%s1140_s1] sm:$0xff]  ;;  %v230_v16 = vld [vmem:[%s1006_s13 + $0x10] sm:$0xff]  ;;  %v478_v17 = vld [vmem:[%s1142_s3 + $0x48] sm:$0xff] }
  0x11   : > { %800 = vmatpush3.msra.mxu0 %v249_v2  ;;  %893 = vmatprep.subr.mxu1 %v482_v7  ;;  %v231_v18 = vld [vmem:[%s1006_s13 + $0x18] sm:$0xff]  ;;  %v232_v19 = vld [vmem:[%s1006_s13 + $0x20] sm:$0xff]  ;;  %v233_v21 = vld [vmem:[%s1006_s13 + $0x28] sm:$0xff] }
  0x12   : > { %801 = vmatprep.subr.mxu0 %v248_v4  ;;  %811 = vmatprep.mubr.msk.f32.mxu0 %vm259_vm0, %v228_v8  ;;  %v477_v20 = vld [vmem:[%s1142_s3 + $0x40] sm:$0xff]  ;;  %v234_v22 = vld [vmem:[%s1006_s13 + $0x30] sm:$0xff]  ;;  %v476_v23 = vld [vmem:[%s1142_s3 + $0x38] sm:$0xff] }
  0x13   : > { %802 = vmatpush3.msra.mxu0 %v248_v4  ;;  %909 = vmatpush3.msra.mxu1 %v482_v7  ;;  %v235_v24 = vld [vmem:[%s1006_s13 + $0x38] sm:$0xff]  ;;  %v236_v25 = vld [vmem:[%s1006_s13 + $0x40] sm:$0xff]  ;;  %v475_v26 = vld [vmem:[%s1142_s3 + $0x30] sm:$0xff] }
  0x14   : > { %803 = vmatprep.subr.mxu0 %v247_v6  ;;  %894 = vmatprep.subr.mxu1 %v481_v10  ;;  %v237_v27 = vld [vmem:[%s1006_s13 + $0x48] sm:$0xff]  ;;  %v238_v28 = vld [vmem:[%s1006_s13 + $0x50] sm:$0xff]  ;;  %v239_v30 = vld [vmem:[%s1006_s13 + $0x58] sm:$0xff] }
  0x15   : > { %804 = vmatpush3.msra.mxu0 %v247_v6  ;;  %910 = vmatpush3.msra.mxu1 %v481_v10  ;;  %v474_v29 = vld [vmem:[%s1142_s3 + $0x28] sm:$0xff]  ;;  %v240_v31 = vld [vmem:[%s1006_s13 + $0x60] sm:$0xff]  ;;  %v242_v34 = vld [vmem:[%s1006_s13 + $0x70] sm:$0xff] }
  0x16   : > { %805 = vmatprep.subr.mxu0 %v246_v9  ;;  %895 = vmatprep.subr.mxu1 %v480_v12  ;;  %v473_v32 = vld [vmem:[%s1142_s3 + $0x20] sm:$0xff]  ;;  %v241_v33 = vld [vmem:[%s1006_s13 + $0x68] sm:$0xff]  ;;  %v243_v35 = vld [vmem:[%s1006_s13 + $0x78] sm:$0xff] }
  0x17   : > { %806 = vmatpush3.msra.mxu0 %v246_v9  ;;  %911 = vmatpush3.msra.mxu1 %v480_v12  ;;  %v472_v36 = vld [vmem:[%s1142_s3 + $0x18] sm:$0xff]  ;;  %v471_v37 = vld [vmem:[%s1142_s3 + $0x10] sm:$0xff]  ;;  %v470_v38 = vld [vmem:[%s1142_s3 + $0x8] sm:$0xff] }
  0x18   : > { %807 = vmatprep.subr.mxu0 %v245_v11  ;;  %896 = vmatprep.subr.mxu1 %v479_v14  ;;  %v469_v39 = vld [vmem:[%s1142_s3] sm:$0xff] }
  0x19   : > { %808 = vmatpush3.msra.mxu0 %v245_v11  ;;  %912 = vmatpush3.msra.mxu1 %v479_v14  ;;  %v719_v40 = vld [vmem:[%s1141_s2] ss:$0 sm:$0xff] }
  0x1a   : > { %809 = vmatprep.subr.mxu0 %v244_v13  ;;  %897 = vmatprep.subr.mxu1 %v478_v17 }
  0x1b   : > { %810 = vmatpush3.msra.mxu0 %v244_v13  ;;  %913 = vmatpush3.msra.mxu1 %v478_v17 }
  0x1c   : > { %812 = vmatmul.mubr.msk.f32.vlgmr.msra.gmra.mxu0 %vm259_vm0, %v229_v15  ;;  %835 = vmatprep.subr.mxu0 %v484_v3 }
  0x1d   : > { %814 = vmatprep.mubr.msk.f32.mxu0 %vm259_vm0, %v230_v16  ;;  %836 = vmatpush3.msra.mxu0 %v484_v3 }
  0x1e   : > { %837 = vmatprep.subr.mxu0 %v483_v5  ;;  %898 = vmatprep.subr.mxu1 %v477_v20 }
  0x1f   : > { %838 = vmatpush3.msra.mxu0 %v483_v5  ;;  %914 = vmatpush3.msra.mxu1 %v477_v20 }
  0x20   : > { %815 = vmatmul.mubr.msk.f32.gmra.mxu0 %vm259_vm0, %v231_v18  ;;  %839 = vmatprep.subr.mxu0 %v482_v7 }
  0x21   : > { %817 = vmatprep.mubr.msk.f32.mxu0 %vm259_vm0, %v232_v19  ;;  %840 = vmatpush3.msra.mxu0 %v482_v7 }
  0x22   : > { %841 = vmatprep.subr.mxu0 %v481_v10  ;;  %899 = vmatprep.subr.mxu1 %v476_v23 }
  0x23   : > { %842 = vmatpush3.msra.mxu0 %v481_v10  ;;  %915 = vmatpush3.msra.mxu1 %v476_v23 }
  0x24   : > { %818 = vmatmul.mubr.msk.f32.gmra.mxu0 %vm259_vm0, %v233_v21  ;;  %843 = vmatprep.subr.mxu0 %v480_v12 }
  0x25   : > { %820 = vmatprep.mubr.msk.f32.mxu0 %vm259_vm0, %v234_v22  ;;  %844 = vmatpush3.msra.mxu0 %v480_v12 }
  0x26   : > { %845 = vmatprep.subr.mxu0 %v479_v14  ;;  %900 = vmatprep.subr.mxu1 %v475_v26 }
  0x27   : > { %846 = vmatpush3.msra.mxu0 %v479_v14  ;;  %916 = vmatpush3.msra.mxu1 %v475_v26 }
  0x28   : > { %821 = vmatmul.mubr.msk.f32.gmra.mxu0 %vm259_vm0, %v235_v24  ;;  %847 = vmatprep.subr.mxu0 %v478_v17 }
  0x29   : > { %823 = vmatprep.mubr.msk.f32.mxu0 %vm259_vm0, %v236_v25  ;;  %848 = vmatpush3.msra.mxu0 %v478_v17  ;;  %v736_v25 = vld [vmem:[%s1143_s4] ss:$0 sm:$0xff] }
  0x2a   : > { %849 = vmatprep.subr.mxu0 %v477_v20  ;;  %901 = vmatprep.subr.mxu1 %v474_v29 }
  0x2b   : > { %850 = vmatpush3.msra.mxu0 %v477_v20  ;;  %917 = vmatpush3.msra.mxu1 %v474_v29 }
  0x2c   : > { %824 = vmatmul.mubr.msk.f32.gmra.mxu0 %vm259_vm0, %v237_v27  ;;  %851 = vmatprep.subr.mxu0 %v476_v23 }
  0x2d   : > { %826 = vmatprep.mubr.msk.f32.mxu0 %vm259_vm0, %v238_v28  ;;  %852 = vmatpush3.msra.mxu0 %v476_v23 }
  0x2e   : > { %853 = vmatprep.subr.mxu0 %v475_v26  ;;  %902 = vmatprep.subr.mxu1 %v473_v32 }
  0x2f   : > { %854 = vmatpush3.msra.mxu0 %v475_v26  ;;  %918 = vmatpush3.msra.mxu1 %v473_v32 }
  0x30   : > { %827 = vmatmul.mubr.msk.f32.gmra.mxu0 %vm259_vm0, %v239_v30  ;;  %855 = vmatprep.subr.mxu0 %v474_v29 }
  0x31   : > { %829 = vmatprep.mubr.msk.f32.mxu0 %vm259_vm0, %v240_v31  ;;  %856 = vmatpush3.msra.mxu0 %v474_v29 }
  0x32   : > { %857 = vmatprep.subr.mxu0 %v473_v32  ;;  %903 = vmatprep.subr.mxu1 %v472_v36 }
  0x33   : > { %858 = vmatpush3.msra.mxu0 %v473_v32  ;;  %919 = vmatpush3.msra.mxu1 %v472_v36 }
  0x34   : > { %830 = vmatmul.mubr.msk.f32.gmra.mxu0 %vm259_vm0, %v241_v33  ;;  %859 = vmatprep.subr.mxu0 %v472_v36 }
  0x35   : > { %832 = vmatprep.mubr.msk.f32.mxu0 %vm259_vm0, %v242_v34  ;;  %860 = vmatpush3.msra.mxu0 %v472_v36 }
  0x36   : > { %861 = vmatprep.subr.mxu0 %v471_v37  ;;  %904 = vmatprep.subr.mxu1 %v471_v37 }
  0x37   : > { %862 = vmatpush3.msra.mxu0 %v471_v37  ;;  %920 = vmatpush3.msra.mxu1 %v471_v37 }
  0x38   : > { %833 = vmatmul.mubr.msk.f32.gmra.mxu0 %vm259_vm0, %v243_v35  ;;  %863 = vmatprep.subr.mxu0 %v470_v38 }
  0x39   : > { %905 = vmatprep.subr.mxu1 %v470_v38  ;;  %864 = vmatpush3.msra.mxu0 %v470_v38 }
  0x3a   : > { %921 = vmatpush3.msra.mxu1 %v470_v38  ;;  %865 = vmatprep.subr.mxu0 %v469_v39 }
  0x3b   : > { %906 = vmatprep.subr.mxu1 %v469_v39  ;;  %866 = vmatpush3.msra.mxu0 %v469_v39 }
  0x3c   : > { %922 = vmatpush3.msra.mxu1 %v469_v39 }
  0xdc   : > { %v813_v41 = vpop.f32.mrf.mxu0 }
  0xdd   : > { %v380_v42 = vadd.f32 %v813_v41, %v719_v40 }
  0xde   : > { %v374_v43 = vpop.f32.mrf.mxu0 }
  0xdf   : > { %v375_v44 = vadd.f32 %v719_v40, %v374_v43  ;;  %v454_v47 = vmax.f32 %v380_v42, 0.0 }
  0xe0   : > { %v816_v45 = vpop.f32.mrf.mxu0 }
  0xe1   : > { %v453_v46 = vmax.f32 %v375_v44, 0.0  ;;  %v390_v48 = vadd.f32 %v816_v45, %v719_v40 }
  0xe2   : > { %v384_v49 = vpop.f32.mrf.mxu0 }
  0xe3   : > { %v385_v50 = vadd.f32 %v719_v40, %v384_v49  ;;  %867 = vmatprep.mubr.f32.mxu0 %v453_v46  ;;  %v456_v53 = vmax.f32 %v390_v48, 0.0 }
  0xe4   : > { %v819_v51 = vpop.f32.mrf.mxu0  ;;  %868 = vmatmul.mubr.f32.vlgmr.msra.gmra.mxu0 %v454_v47 }
  0xe5   : > { %v455_v52 = vmax.f32 %v385_v50, 0.0  ;;  %v400_v54 = vadd.f32 %v819_v51, %v719_v40 }
  0xe6   : > { %v394_v55 = vpop.f32.mrf.mxu0 }
  0xe7   : > { %870 = vmatprep.mubr.f32.mxu0 %v455_v52  ;;  %v395_v56 = vadd.f32 %v719_v40, %v394_v55  ;;  %v458_v59 = vmax.f32 %v400_v54, 0.0 }
  0xe8   : > { %v822_v57 = vpop.f32.mrf.mxu0  ;;  %871 = vmatmul.mubr.f32.gmra.mxu0 %v456_v53 }
  0xe9   : > { %v457_v58 = vmax.f32 %v395_v56, 0.0  ;;  %v410_v60 = vadd.f32 %v822_v57, %v719_v40 }
  0xea   : > { %v404_v61 = vpop.f32.mrf.mxu0 }
  0xeb   : > { %v405_v62 = vadd.f32 %v719_v40, %v404_v61  ;;  %873 = vmatprep.mubr.f32.mxu1 %v457_v58  ;;  %v460_v1 = vmax.f32 %v410_v60, 0.0 }
  0xec   : > { %v825_v63 = vpop.f32.mrf.mxu0  ;;  %874 = vmatmul.mubr.f32.vlgmr.msra.gmra.mxu1 %v458_v59 }
  0xed   : > { %v459_v0 = vmax.f32 %v405_v62, 0.0  ;;  %v420_v2 = vadd.f32 %v825_v63, %v719_v40 }
  0xee   : > { %v414_v3 = vpop.f32.mrf.mxu0 }
  0xef   : > { %v415_v4 = vadd.f32 %v719_v40, %v414_v3  ;;  %876 = vmatprep.mubr.f32.mxu1 %v459_v0  ;;  %v462_v7 = vmax.f32 %v420_v2, 0.0 }
  0xf0   : > { %v828_v5 = vpop.f32.mrf.mxu0  ;;  %877 = vmatmul.mubr.f32.gmra.mxu1 %v460_v1 }
  0xf1   : > { %v461_v6 = vmax.f32 %v415_v4, 0.0  ;;  %v430_v8 = vadd.f32 %v828_v5, %v719_v40 }
  0xf2   : > { %v424_v9 = vpop.f32.mrf.mxu0 }
  0xf3   : > { %v425_v10 = vadd.f32 %v719_v40, %v424_v9  ;;  %879 = vmatprep.mubr.f32.mxu1 %v461_v6  ;;  %v464_v13 = vmax.f32 %v430_v8, 0.0 }
  0xf4   : > { %v831_v11 = vpop.f32.mrf.mxu0  ;;  %880 = vmatmul.mubr.f32.gmra.mxu1 %v462_v7 }
  0xf5   : > { %v463_v12 = vmax.f32 %v425_v10, 0.0  ;;  %v440_v14 = vadd.f32 %v831_v11, %v719_v40 }
  0xf6   : > { %v434_v15 = vpop.f32.mrf.mxu0 }
  0xf7   : > { %v435_v16 = vadd.f32 %v719_v40, %v434_v15  ;;  %882 = vmatprep.mubr.f32.mxu1 %v463_v12  ;;  %v466_v19 = vmax.f32 %v440_v14, 0.0 }
  0xf8   : > { %v834_v17 = vpop.f32.mrf.mxu0  ;;  %883 = vmatmul.mubr.f32.gmra.mxu1 %v464_v13 }
  0xf9   : > { %v465_v18 = vmax.f32 %v435_v16, 0.0  ;;  %v450_v20 = vadd.f32 %v834_v17, %v719_v40 }
  0xfa   : > { %v444_v21 = vpop.f32.mrf.mxu0 }
  0xfb   : > { %v445_v22 = vadd.f32 %v719_v40, %v444_v21  ;;  %885 = vmatprep.mubr.f32.mxu1 %v465_v18  ;;  %v468_v24 = vmax.f32 %v450_v20, 0.0 }
  0xfc   : > { %886 = vmatmul.mubr.f32.gmra.mxu1 %v466_v19 }
  0xfd   : > { %v467_v23 = vmax.f32 %v445_v22, 0.0 }
  0xff   : > { %888 = vmatprep.mubr.f32.mxu1 %v467_v23 }
 0x100   : > { %889 = vmatmul.mubr.f32.gmra.mxu1 %v468_v24 }
 0x1a4   : > { %v869_v26 = vpop.f32.mrf.mxu0 }
 0x1a5   : > { %v564_v27 = vadd.f32 %v869_v26, %v736_v25 }
 0x1a6   : > { %v558_v28 = vpop.f32.mrf.mxu0 }
 0x1a7   : > { %639 = vst.msk [vmem:[%s1102_s10 + $0x8] sm:$0xff] %vm637_vm1, %v564_v27  ;;  %v559_v29 = vadd.f32 %v736_v25, %v558_v28 }
 0x1a8   : > { %v872_v30 = vpop.f32.mrf.mxu0 }
 0x1a9   : > { %638 = vst.msk [vmem:[%s1102_s10] sm:$0xff] %vm637_vm1, %v559_v29  ;;  %v574_v31 = vadd.f32 %v872_v30, %v736_v25 }
 0x1aa   : > { %v568_v32 = vpop.f32.mrf.mxu0 }
 0x1ab   : > { %641 = vst.msk [vmem:[%s1102_s10 + $0x18] sm:$0xff] %vm637_vm1, %v574_v31  ;;  %v569_v33 = vadd.f32 %v736_v25, %v568_v32 }
 0x1ac   : > { %v875_v34 = vpop.f32.mrf.mxu1 }
 0x1ad   : > { %640 = vst.msk [vmem:[%s1102_s10 + $0x10] sm:$0xff] %vm637_vm1, %v569_v33  ;;  %v584_v35 = vadd.f32 %v875_v34, %v736_v25 }
 0x1ae   : > { %v578_v36 = vpop.f32.mrf.mxu1 }
 0x1af   : > { %643 = vst.msk [vmem:[%s1102_s10 + $0x28] sm:$0xff] %vm637_vm1, %v584_v35  ;;  %v579_v37 = vadd.f32 %v736_v25, %v578_v36 }
 0x1b0   : > { %v878_v38 = vpop.f32.mrf.mxu1 }
 0x1b1   : > { %642 = vst.msk [vmem:[%s1102_s10 + $0x20] sm:$0xff] %vm637_vm1, %v579_v37  ;;  %v594_v39 = vadd.f32 %v878_v38, %v736_v25 }
 0x1b2   : > { %v588_v40 = vpop.f32.mrf.mxu1 }
 0x1b3   : > { %645 = vst.msk [vmem:[%s1102_s10 + $0x38] sm:$0xff] %vm637_vm1, %v594_v39  ;;  %v589_v41 = vadd.f32 %v736_v25, %v588_v40 }
 0x1b4   : > { %v881_v42 = vpop.f32.mrf.mxu1 }
 0x1b5   : > { %644 = vst.msk [vmem:[%s1102_s10 + $0x30] sm:$0xff] %vm637_vm1, %v589_v41  ;;  %v604_v43 = vadd.f32 %v881_v42, %v736_v25 }
 0x1b6   : > { %v598_v44 = vpop.f32.mrf.mxu1 }
 0x1b7   : > { %647 = vst.msk [vmem:[%s1102_s10 + $0x48] sm:$0xff] %vm637_vm1, %v604_v43  ;;  %v599_v45 = vadd.f32 %v736_v25, %v598_v44 }
 0x1b8   : > { %v884_v46 = vpop.f32.mrf.mxu1 }
 0x1b9   : > { %646 = vst.msk [vmem:[%s1102_s10 + $0x40] sm:$0xff] %vm637_vm1, %v599_v45  ;;  %v614_v47 = vadd.f32 %v884_v46, %v736_v25 }
 0x1ba   : > { %v608_v48 = vpop.f32.mrf.mxu1 }
 0x1bb   : > { %649 = vst.msk [vmem:[%s1102_s10 + $0x58] sm:$0xff] %vm637_vm1, %v614_v47  ;;  %v609_v49 = vadd.f32 %v736_v25, %v608_v48 }
 0x1bc   : > { %v887_v50 = vpop.f32.mrf.mxu1 }
 0x1bd   : > { %648 = vst.msk [vmem:[%s1102_s10 + $0x50] sm:$0xff] %vm637_vm1, %v609_v49  ;;  %v624_v51 = vadd.f32 %v887_v50, %v736_v25 }
 0x1be   : > { %v618_v52 = vpop.f32.mrf.mxu1 }
 0x1bf   : > { %651 = vst.msk [vmem:[%s1102_s10 + $0x68] sm:$0xff] %vm637_vm1, %v624_v51  ;;  %v619_v53 = vadd.f32 %v736_v25, %v618_v52 }
 0x1c0   : > { %v890_v54 = vpop.f32.mrf.mxu1 }
 0x1c1   : > { %650 = vst.msk [vmem:[%s1102_s10 + $0x60] sm:$0xff] %vm637_vm1, %v619_v53  ;;  %v634_v55 = vadd.f32 %v890_v54, %v736_v25 }
 0x1c2   : > { %v628_v56 = vpop.f32.mrf.mxu1 }
 0x1c3   : > { %653 = vst.msk [vmem:[%s1102_s10 + $0x78] sm:$0xff] %vm637_vm1, %v634_v55  ;;  %v629_v57 = vadd.f32 %v736_v25, %v628_v56 }
 0x1c5   : > { %652 = vst.msk [vmem:[%s1102_s10 + $0x70] sm:$0xff] %vm637_vm1, %v629_v57 }
 0x1c6 PF: > { %s15_s18 = sadd.s32 1, %s937_s18  }
 0x1c7   : > { %p12_p4 = scmp.ge.s32.totalorder %s15_s18, 4  }
 0x1c9   :  { %14 = sbr.rel (!%p12_p4) target bundleno = 1 (0x1), region = 70 }

</bundles_post_ra>
